<compile_context>
chip_gen: v7x
topology: tpu7x:2x2x1
jax: 0.10.0
libtpu: 0.0.40
codegen_flags: <defaults>
</compile_context>

<pallas_src>
import functools

import jax
import jax.numpy as jnp
from jax.experimental import pallas as pl
from jax.experimental.pallas import tpu as pltpu

LANE = 128


def _round_up(n: int, m: int) -> int:
    return (n + m - 1) // m * m


def branchnet_kernel(
    x_ref,                          # (TILE_B, K_pad) bf16
    w1_ref, sc1_ref, sh1_ref,       # (K_pad, 256) bf16, (1, 256) f32, (1, 256) f32
    w2_ref, sc2_ref, sh2_ref,       # (256, 128) bf16, (1, 128) f32, (1, 128) f32
    w3_ref, b3_ref,                 # (128, H_pad) bf16, (1, H_pad) f32
    beta1_ref, beta2_ref,           # (1, 1) f32 scalars in SMEM
    out_ref,                        # (TILE_B, H_pad) f32
):
    x = x_ref[...]

    # ---- layer 1: Linear(in_dim -> 256) + BN(256) + TrainableSwish ----
    h = jnp.dot(x, w1_ref[...], preferred_element_type=jnp.float32)
    h = h * sc1_ref[...] + sh1_ref[...]            # folded (linear bias + batchnorm)
    h = h * jax.nn.sigmoid(beta1_ref[0, 0] * h)    # swish(x, beta) = x * sigmoid(beta*x)

    # ---- layer 2: Linear(256 -> 128) + BN(128) + TrainableSwish ----
    h = jnp.dot(h.astype(jnp.bfloat16), w2_ref[...],
                preferred_element_type=jnp.float32)
    h = h * sc2_ref[...] + sh2_ref[...]
    h = h * jax.nn.sigmoid(beta2_ref[0, 0] * h)

    # ---- layer 3: Linear(128 -> hidden_dim) (no norm / activation) ----
    h = jnp.dot(h.astype(jnp.bfloat16), w3_ref[...],
                preferred_element_type=jnp.float32)
    h = h + b3_ref[...]

    out_ref[...] = h.astype(out_ref.dtype)


@functools.partial(jax.jit, static_argnames=("hidden_dim", "tile_b"))
def branchnet_forward(x, params, *, hidden_dim, tile_b=512):
    """x: (B, in_dim) float32. params: dict from make_params (padded / bf16)."""
    B, in_dim = x.shape
    k_pad = params["w1"].shape[0]      # in_dim padded to multiple of 128
    h1 = params["w1"].shape[1]         # 256
    h2 = params["w2"].shape[1]         # 128
    h_pad = params["w3"].shape[1]      # hidden_dim padded to multiple of 128

    # Batch tile: multiple of 16 (bf16 sublane packing); 512 keeps the x/out DMA
    # pipeline >85% of HBM roofline while staying well under scoped VMEM on all
    # of v5e/v6e/v7x (2 bufs * 512 * (384 bf16 + 128 f32) ~ 1.3 MiB).
    tile = tile_b if B >= tile_b else _round_up(max(B, 1), 16)
    b_pad = _round_up(B, tile)

    xb = jnp.pad(x.astype(jnp.bfloat16), ((0, b_pad - B), (0, k_pad - in_dim)))

    const = lambda i: (0, 0)
    smem = pl.BlockSpec(memory_space=pltpu.MemorySpace.SMEM)

    out = pl.pallas_call(
        branchnet_kernel,
        out_shape=jax.ShapeDtypeStruct((b_pad, h_pad), jnp.float32),
        grid=(b_pad // tile,),
        in_specs=[
            pl.BlockSpec((tile, k_pad), lambda i: (i, 0)),   # x: tiled over batch
            pl.BlockSpec((k_pad, h1), const),                # w1 (resident)
            pl.BlockSpec((1, h1), const),                    # sc1
            pl.BlockSpec((1, h1), const),                    # sh1
            pl.BlockSpec((h1, h2), const),                   # w2
            pl.BlockSpec((1, h2), const),                    # sc2
            pl.BlockSpec((1, h2), const),                    # sh2
            pl.BlockSpec((h2, h_pad), const),                # w3
            pl.BlockSpec((1, h_pad), const),                 # b3
            smem,                                            # beta1 scalar
            smem,                                            # beta2 scalar
        ],
        out_specs=pl.BlockSpec((tile, h_pad), lambda i: (i, 0)),
        compiler_params=pltpu.CompilerParams(
            dimension_semantics=("parallel",),               # megacore on v7x
        ),
    )(
        xb,
        params["w1"], params["sc1"], params["sh1"],
        params["w2"], params["sc2"], params["sh2"],
        params["w3"], params["b3"],
        params["beta1"], params["beta2"],
    )
    return out[:B, :hidden_dim]


def make_params(key, in_dim=302, hidden_dim=32, eps=1e-5):
    """Deterministic synthetic parameters.

    Returns (kernel_params, ref_params): kernel params are pre-transposed,
    zero-padded and cast to bf16 where they feed the MXU; BN + linear bias are
    folded into per-feature (scale, shift).  ref_params are unpadded f32 copies
    for the pure-JAX reference.
    """
    ks = jax.random.split(key, 14)
    f32 = jnp.float32

    def lin(kw, kb, fan_in, fan_out):
        bound = 1.0 / jnp.sqrt(f32(fan_in))
        w = jax.random.uniform(kw, (fan_in, fan_out), f32, -bound, bound)  # (in, out)
        b = jax.random.uniform(kb, (fan_out,), f32, -bound, bound)
        return w, b

    w1, b1 = lin(ks[0], ks[1], in_dim, 256)
    w2, b2 = lin(ks[2], ks[3], 256, 128)
    w3, b3 = lin(ks[4], ks[5], 128, hidden_dim)

    def bn(kg, kb, km, kv, n):
        gamma = 1.0 + 0.1 * jax.random.normal(kg, (n,), f32)
        beta = 0.1 * jax.random.normal(kb, (n,), f32)
        rmean = 0.1 * jax.random.normal(km, (n,), f32)
        rvar = jnp.abs(jax.random.normal(kv, (n,), f32)) + 0.5
        return gamma, beta, rmean, rvar

    g1, bb1, m1, v1 = bn(ks[6], ks[7], ks[8], ks[9], 256)
    g2, bb2, m2, v2 = bn(ks[10], ks[11], ks[12], ks[13], 128)

    # TODO(synk): BatchNorm1d is implemented in inference mode (running stats);
    # training-mode per-batch statistics are not computed in-kernel.
    # fold:  BN(linear(x)) = (x@W + b - mean) * g / sqrt(var+eps) + bn_beta
    #                      = (x@W) * sc + sh
    s1 = g1 * jax.lax.rsqrt(v1 + eps)
    sh1 = (b1 - m1) * s1 + bb1
    s2 = g2 * jax.lax.rsqrt(v2 + eps)
    sh2 = (b2 - m2) * s2 + bb2

    ref_params = {
        "w1": w1, "sc1": s1.reshape(1, -1), "sh1": sh1.reshape(1, -1),
        "w2": w2, "sc2": s2.reshape(1, -1), "sh2": sh2.reshape(1, -1),
        "w3": w3, "b3": b3.reshape(1, -1),
        "beta1": f32(1.0), "beta2": f32(1.0),
    }

    # kernel params: pad K (in_dim) and output lanes to multiples of 128; bf16 weights
    k_pad = _round_up(in_dim, LANE)
    h_pad = _round_up(hidden_dim, LANE)
    w1p = jnp.pad(w1, ((0, k_pad - in_dim), (0, 0))).astype(jnp.bfloat16)
    w2p = w2.astype(jnp.bfloat16)
    w3p = jnp.pad(w3, ((0, 0), (0, h_pad - hidden_dim))).astype(jnp.bfloat16)
    b3p = jnp.pad(b3, (0, h_pad - hidden_dim)).reshape(1, -1)

    kernel_params = {
        "w1": w1p, "sc1": s1.reshape(1, -1), "sh1": sh1.reshape(1, -1),
        "w2": w2p, "sc2": s2.reshape(1, -1), "sh2": sh2.reshape(1, -1),
        "w3": w3p, "b3": b3p,
        "beta1": jnp.ones((1, 1), f32),      # TrainableSwish beta = 1.0
        "beta2": jnp.ones((1, 1), f32),
    }
    return kernel_params, ref_params


def branchnet_reference(x, ref):
    """Pure-JAX f32 reference for correctness check."""
    h = x @ ref["w1"] * ref["sc1"] + ref["sh1"]
    h = h * jax.nn.sigmoid(ref["beta1"] * h)
    h = h @ ref["w2"] * ref["sc2"] + ref["sh2"]
    h = h * jax.nn.sigmoid(ref["beta2"] * h)
    return h @ ref["w3"] + ref["b3"]


if __name__ == "__main__":
    key = jax.random.PRNGKey(0)
    kx, kp = jax.random.split(key)

    B, IN_DIM, HIDDEN = 8, 302, 32
    x = jax.random.normal(kx, (B, IN_DIM), jnp.float32)
    params, ref_params = make_params(kp, in_dim=IN_DIM, hidden_dim=HIDDEN)

    out = branchnet_forward(x, params, hidden_dim=HIDDEN)
    out = jax.block_until_ready(out)

    ref = branchnet_reference(x, ref_params)
    assert out.shape == (B, HIDDEN)
    # bf16 MXU operands (f32 accumulation) -> loosened tolerance vs f32 reference.
    max_err = jnp.max(jnp.abs(out - ref))
    assert jnp.allclose(out, ref, atol=5e-2, rtol=5e-2), (
        f"mismatch vs reference: max abs err {max_err}")

    print("KERNEL_OK")
</pallas_src>

<mosaic_0001>
module attributes {stable_mosaic.version = 11 : i64} {
  func.func @branchnet_kernel(%arg0: i32, %arg1: memref<16x384xbf16, #tpu.memory_space<vmem>>, %arg2: memref<384x256xbf16, #tpu.memory_space<vmem>>, %arg3: memref<1x256xf32, #tpu.memory_space<vmem>>, %arg4: memref<1x256xf32, #tpu.memory_space<vmem>>, %arg5: memref<256x128xbf16, #tpu.memory_space<vmem>>, %arg6: memref<1x128xf32, #tpu.memory_space<vmem>>, %arg7: memref<1x128xf32, #tpu.memory_space<vmem>>, %arg8: memref<128x128xbf16, #tpu.memory_space<vmem>>, %arg9: memref<1x128xf32, #tpu.memory_space<vmem>>, %arg10: memref<1x1xf32, #tpu.memory_space<smem>>, %arg11: memref<1x1xf32, #tpu.memory_space<smem>>, %arg12: memref<16x128xf32, #tpu.memory_space<vmem>>) attributes {dimension_semantics = [#tpu.dimension_semantics<parallel>], iteration_bounds = array<i64: 1>, scalar_prefetch = 0 : i64, scratch_operands = 0 : i64, tpu.core_type = #tpu.core_type<tc>, window_params = [{transform_indices = @transform_0, window_bounds = array<i64: 16, 384>}, {pipeline_mode = #tpu.pipeline_mode<synchronous>, transform_indices = @transform_1, window_bounds = array<i64: 384, 256>}, {pipeline_mode = #tpu.pipeline_mode<synchronous>, transform_indices = @transform_2, window_bounds = array<i64: 1, 256>}, {pipeline_mode = #tpu.pipeline_mode<synchronous>, transform_indices = @transform_3, window_bounds = array<i64: 1, 256>}, {pipeline_mode = #tpu.pipeline_mode<synchronous>, transform_indices = @transform_4, window_bounds = array<i64: 256, 128>}, {pipeline_mode = #tpu.pipeline_mode<synchronous>, transform_indices = @transform_5, window_bounds = array<i64: 1, 128>}, {pipeline_mode = #tpu.pipeline_mode<synchronous>, transform_indices = @transform_6, window_bounds = array<i64: 1, 128>}, {pipeline_mode = #tpu.pipeline_mode<synchronous>, transform_indices = @transform_7, window_bounds = array<i64: 128, 128>}, {pipeline_mode = #tpu.pipeline_mode<synchronous>, transform_indices = @transform_8, window_bounds = array<i64: 1, 128>}, {transform_indices = @transform_9, window_bounds = array<i64: 1, 1>}, {transform_indices = @transform_10, window_bounds = array<i64: 1, 1>}, {transform_indices = @transform_11, window_bounds = array<i64: 16, 128>}]} {
    %c0 = arith.constant 0 : index
    %c0_0 = arith.constant 0 : index
    %0 = vector.load %arg1[%c0, %c0_0] : memref<16x384xbf16, #tpu.memory_space<vmem>>, vector<16x384xbf16>
    %c0_1 = arith.constant 0 : index
    %c0_2 = arith.constant 0 : index
    %1 = vector.load %arg2[%c0_1, %c0_2] : memref<384x256xbf16, #tpu.memory_space<vmem>>, vector<384x256xbf16>
    %cst = arith.constant dense<0.000000e+00> : vector<16x256xf32>
    %2 = tpu.matmul %0, %1, %cst {dimension_numbers = #tpu.dot_dimension_numbers<[1], [0], [0], [1], [0, 0, 1, 1], [], []>} : vector<16x384xbf16>, vector<384x256xbf16>, vector<16x256xf32> -> vector<16x256xf32>
    %c0_3 = arith.constant 0 : index
    %c0_4 = arith.constant 0 : index
    %3 = vector.load %arg3[%c0_3, %c0_4] : memref<1x256xf32, #tpu.memory_space<vmem>>, vector<1x256xf32>
    %4 = vector.broadcast %3 : vector<1x256xf32> to vector<16x256xf32>
    %5 = arith.mulf %2, %4 : vector<16x256xf32>
    %c0_5 = arith.constant 0 : index
    %c0_6 = arith.constant 0 : index
    %6 = vector.load %arg4[%c0_5, %c0_6] : memref<1x256xf32, #tpu.memory_space<vmem>>, vector<1x256xf32>
    %7 = vector.broadcast %6 : vector<1x256xf32> to vector<16x256xf32>
    %8 = arith.addf %5, %7 : vector<16x256xf32>
    %c0_7 = arith.constant 0 : index
    %c0_8 = arith.constant 0 : index
    %9 = memref.load %arg10[%c0_7, %c0_8] : memref<1x1xf32, #tpu.memory_space<smem>>
    %10 = vector.broadcast %9 : f32 to vector<16x256xf32>
    %11 = arith.mulf %10, %8 : vector<16x256xf32>
    %12 = arith.negf %11 : vector<16x256xf32>
    %13 = math.exp %12 : vector<16x256xf32>
    %cst_9 = arith.constant 1.000000e+00 : f32
    %14 = vector.broadcast %cst_9 : f32 to vector<16x256xf32>
    %15 = arith.addf %14, %13 : vector<16x256xf32>
    %16 = arith.divf %14, %15 : vector<16x256xf32>
    %17 = arith.mulf %8, %16 : vector<16x256xf32>
    %18 = arith.truncf %17 : vector<16x256xf32> to vector<16x256xbf16>
    %c0_10 = arith.constant 0 : index
    %c0_11 = arith.constant 0 : index
    %19 = vector.load %arg5[%c0_10, %c0_11] : memref<256x128xbf16, #tpu.memory_space<vmem>>, vector<256x128xbf16>
    %cst_12 = arith.constant dense<0.000000e+00> : vector<16x128xf32>
    %20 = tpu.matmul %18, %19, %cst_12 {dimension_numbers = #tpu.dot_dimension_numbers<[1], [0], [0], [1], [0, 0, 1, 1], [], []>} : vector<16x256xbf16>, vector<256x128xbf16>, vector<16x128xf32> -> vector<16x128xf32>
    %c0_13 = arith.constant 0 : index
    %c0_14 = arith.constant 0 : index
    %21 = vector.load %arg6[%c0_13, %c0_14] : memref<1x128xf32, #tpu.memory_space<vmem>>, vector<1x128xf32>
    %22 = vector.broadcast %21 : vector<1x128xf32> to vector<16x128xf32>
    %23 = arith.mulf %20, %22 : vector<16x128xf32>
    %c0_15 = arith.constant 0 : index
    %c0_16 = arith.constant 0 : index
    %24 = vector.load %arg7[%c0_15, %c0_16] : memref<1x128xf32, #tpu.memory_space<vmem>>, vector<1x128xf32>
    %25 = vector.broadcast %24 : vector<1x128xf32> to vector<16x128xf32>
    %26 = arith.addf %23, %25 : vector<16x128xf32>
    %c0_17 = arith.constant 0 : index
    %c0_18 = arith.constant 0 : index
    %27 = memref.load %arg11[%c0_17, %c0_18] : memref<1x1xf32, #tpu.memory_space<smem>>
    %28 = vector.broadcast %27 : f32 to vector<16x128xf32>
    %29 = arith.mulf %28, %26 : vector<16x128xf32>
    %30 = arith.negf %29 : vector<16x128xf32>
    %31 = math.exp %30 : vector<16x128xf32>
    %cst_19 = arith.constant 1.000000e+00 : f32
    %32 = vector.broadcast %cst_19 : f32 to vector<16x128xf32>
    %33 = arith.addf %32, %31 : vector<16x128xf32>
    %34 = arith.divf %32, %33 : vector<16x128xf32>
    %35 = arith.mulf %26, %34 : vector<16x128xf32>
    %36 = arith.truncf %35 : vector<16x128xf32> to vector<16x128xbf16>
    %c0_20 = arith.constant 0 : index
    %c0_21 = arith.constant 0 : index
    %37 = vector.load %arg8[%c0_20, %c0_21] : memref<128x128xbf16, #tpu.memory_space<vmem>>, vector<128x128xbf16>
    %cst_22 = arith.constant dense<0.000000e+00> : vector<16x128xf32>
    %38 = tpu.matmul %36, %37, %cst_22 {dimension_numbers = #tpu.dot_dimension_numbers<[1], [0], [0], [1], [0, 0, 1, 1], [], []>} : vector<16x128xbf16>, vector<128x128xbf16>, vector<16x128xf32> -> vector<16x128xf32>
    %c0_23 = arith.constant 0 : index
    %c0_24 = arith.constant 0 : index
    %39 = vector.load %arg9[%c0_23, %c0_24] : memref<1x128xf32, #tpu.memory_space<vmem>>, vector<1x128xf32>
    %40 = vector.broadcast %39 : vector<1x128xf32> to vector<16x128xf32>
    %41 = arith.addf %38, %40 : vector<16x128xf32>
    %c0_25 = arith.constant 0 : index
    %c0_26 = arith.constant 0 : index
    %42 = vector.load %arg12[%c0_25, %c0_26] : memref<16x128xf32, #tpu.memory_space<vmem>>, vector<16x128xf32>
    tpu.vector_store %arg12[%c0_25, %c0_26], %41 {strides = array<i32>} : memref<16x128xf32, #tpu.memory_space<vmem>>, vector<16x128xf32>,
    return
  }
  func.func @transform_0(%arg0: i32) -> (i32, i32) {
    %c0_i32 = arith.constant 0 : i32
    %c0_i32_0 = arith.constant 0 : i32
    return %arg0, %c0_i32 : i32, i32
  }
  func.func @transform_1(%arg0: i32) -> (i32, i32) {
    %c0_i32 = arith.constant 0 : i32
    %c0_i32_0 = arith.constant 0 : i32
    %c0_i32_1 = arith.constant 0 : i32
    return %c0_i32, %c0_i32_0 : i32, i32
  }
  func.func @transform_2(%arg0: i32) -> (i32, i32) {
    %c0_i32 = arith.constant 0 : i32
    %c0_i32_0 = arith.constant 0 : i32
    %c0_i32_1 = arith.constant 0 : i32
    return %c0_i32, %c0_i32_0 : i32, i32
  }
  func.func @transform_3(%arg0: i32) -> (i32, i32) {
    %c0_i32 = arith.constant 0 : i32
    %c0_i32_0 = arith.constant 0 : i32
    %c0_i32_1 = arith.constant 0 : i32
    return %c0_i32, %c0_i32_0 : i32, i32
  }
  func.func @transform_4(%arg0: i32) -> (i32, i32) {
    %c0_i32 = arith.constant 0 : i32
    %c0_i32_0 = arith.constant 0 : i32
    %c0_i32_1 = arith.constant 0 : i32
    return %c0_i32, %c0_i32_0 : i32, i32
  }
  func.func @transform_5(%arg0: i32) -> (i32, i32) {
    %c0_i32 = arith.constant 0 : i32
    %c0_i32_0 = arith.constant 0 : i32
    %c0_i32_1 = arith.constant 0 : i32
    return %c0_i32, %c0_i32_0 : i32, i32
  }
  func.func @transform_6(%arg0: i32) -> (i32, i32) {
    %c0_i32 = arith.constant 0 : i32
    %c0_i32_0 = arith.constant 0 : i32
    %c0_i32_1 = arith.constant 0 : i32
    return %c0_i32, %c0_i32_0 : i32, i32
  }
  func.func @transform_7(%arg0: i32) -> (i32, i32) {
    %c0_i32 = arith.constant 0 : i32
    %c0_i32_0 = arith.constant 0 : i32
    %c0_i32_1 = arith.constant 0 : i32
    return %c0_i32, %c0_i32_0 : i32, i32
  }
  func.func @transform_8(%arg0: i32) -> (i32, i32) {
    %c0_i32 = arith.constant 0 : i32
    %c0_i32_0 = arith.constant 0 : i32
    %c0_i32_1 = arith.constant 0 : i32
    return %c0_i32, %c0_i32_0 : i32, i32
  }
  func.func @transform_9(%arg0: i32) -> (i32, i32) {
    %c0_i32 = arith.constant 0 : i32
    %c0_i32_0 = arith.constant 0 : i32
    %c0_i32_1 = arith.constant 0 : i32
    return %c0_i32, %c0_i32_0 : i32, i32
  }
  func.func @transform_10(%arg0: i32) -> (i32, i32) {
    %c0_i32 = arith.constant 0 : i32
    %c0_i32_0 = arith.constant 0 : i32
    %c0_i32_1 = arith.constant 0 : i32
    return %c0_i32, %c0_i32_0 : i32, i32
  }
  func.func @transform_11(%arg0: i32) -> (i32, i32) {
    %c0_i32 = arith.constant 0 : i32
    %c0_i32_0 = arith.constant 0 : i32
    return %arg0, %c0_i32 : i32, i32
  }
}

</mosaic_0001>

<bundles_post_ra>
// kernel: branchnet_forward.1
= control target key start
LH: loop header
LB: loop body
LE: loop exit
PB: predicated region body
PF: predicated region fallthrough
CT: control target
= control target key end

     0   :  { %18 = vsyncpa [#allocation5], 0  ;;  %s1330_s0 = inlined_call_operand.vmem [shape: bf16[16,384], index: 0, kind: input, shape index: {}]   ;;  %s1331_s1 = inlined_call_operand.hbm [shape: bf16[384,256], index: 1, kind: input, shape index: {}]   ;;  %s1332_s2 = inlined_call_operand.vmem [shape: f32[1,256], index: 2, kind: input, shape index: {}]   ;;  %s1333_s3 = inlined_call_operand.vmem [shape: f32[1,256], index: 3, kind: input, shape index: {}]   ;;  %s1334_s4 = inlined_call_operand.hbm [shape: bf16[256,128], index: 4, kind: input, shape index: {}]   ;;  %s1335_s5 = inlined_call_operand.vmem [shape: f32[1,128], index: 5, kind: input, shape index: {}]   ;;  %s1336_s6 = inlined_call_operand.vmem [shape: f32[1,128], index: 6, kind: input, shape index: {}]   ;;  %s1337_s7 = inlined_call_operand.vmem [shape: bf16[128,128], index: 7, kind: input, shape index: {}]   ;;  %s1338_s8 = inlined_call_operand.vmem [shape: f32[1,128], index: 8, kind: input, shape index: {}]   ;;  %s1339_s9 = inlined_call_operand.<no memory space> [shape: f32[1,1], index: 9, kind: input, shape index: {}]   ;;  %s1340_s10 = inlined_call_operand.<no memory space> [shape: f32[1,1], index: 10, kind: input, shape index: {}]   ;;  %s1341_s11 = inlined_call_operand.vmem [shape: f32[16,128], index: 11, kind: output, shape index: {}]  }
   0x1   :  { %19 = vsyncpa [#allocation7], 0  ;;  %s1177_s17 = smov [#allocation4]   ;;  %s1129_s21 = scalar_lea.hbm %s1331_s1, 6144 }
   0x2   :  { %s27_s18 = sshll.u32 %s1177_s17, 4  ;;  %p1130_p0 = scmp.ne.s32.totalorder %s1331_s1, %s1129_s21  ;;  %s28_s18 = int_to_ptr.vmem [resolvable:$true] %s27_s18 }
   0x3   :  { %p1133_p1 = scmp.lt.u32.totalorder %s1129_s21, %s1331_s1 }
   0x5   :  { %p1135_p2 = pnand %p1133_p1, %p1130_p0 }
   0x7   :  { %1138 = shalt.err (!%p1135_p2)
}
   0x8   :  { %s1139_s26 = scalar_lea.vmem %s28_s18, 6144  ;;  %p1144_p4 = scmp.lt.s32.totalorder %s28_s18, %s28_s18 }
   0x9   :  { %p1140_p3 = scmp.ne.s32.totalorder %s28_s18, %s1139_s26  ;;  %p1145_p5 = scmp.lt.s32.totalorder %s1139_s26, %s1139_s26 }
   0xb   :  { %p1146_p6 = por %p1145_p5, %p1144_p4 }
   0xd   :  { %p1147_p7 = pnand %p1146_p6, %p1140_p3 }
   0xf   :  { %1150 = shalt.err (!%p1147_p7)
}
  0x10   :  { %s1178_s27 = smov 128   ;;  %s1179_s28 = smov 8  }
  0x11   :  { %33 = dma.hbm_to_vmem [thread:$0]  %s1331_s1, 6144, %s28_s18, [#allocation5], %s1178_s27, %s1178_s27, %s1179_s28  }
  0x12   :  { %s1180_s12 = smov [#allocation6]   ;;  %s1151_s16 = scalar_lea.hbm %s1334_s4, 2048 }
  0x13   :  { %s43_s13 = sshll.u32 %s1180_s12, 4  ;;  %p1152_p8 = scmp.ne.s32.totalorder %s1334_s4, %s1151_s16  ;;  %s44_s13 = int_to_ptr.vmem [resolvable:$true] %s43_s13 }
  0x14   :  { %p1155_p9 = scmp.lt.u32.totalorder %s1151_s16, %s1334_s4 }
  0x16   :  { %p1157_p10 = pnand %p1155_p9, %p1152_p8 }
  0x18   :  { %1160 = shalt.err (!%p1157_p10)
}
  0x19   :  { %s1161_s22 = scalar_lea.vmem %s44_s13, 2048  ;;  %p1166_p12 = scmp.lt.s32.totalorder %s44_s13, %s44_s13 }
  0x1a   :  { %p1162_p11 = scmp.ne.s32.totalorder %s44_s13, %s1161_s22  ;;  %p1167_p13 = scmp.lt.s32.totalorder %s1161_s22, %s1161_s22 }
  0x1c   :  { %p1168_p0 = por %p1167_p13, %p1166_p12 }
  0x1e   :  { %p1169_p1 = pnand %p1168_p0, %p1162_p11 }
  0x20   :  { %1172 = shalt.err (!%p1169_p1)
}
  0x21   :  { %s1181_s1 = smov 64   ;;  %s1182_s18 = smov 4  }
  0x22   :  { %49 = dma.hbm_to_vmem [thread:$0]  %s1334_s4, 2048, %s44_s13, [#allocation7], %s1181_s1, %s1181_s1, %s1182_s18  }
  0x23   :  { %1173 = dma.done.wait [#allocation5], 6144  }
  0x24   :  { %1174 = vsyncadd [#allocation5], 4294961152 }
  0x25   :  { %1175 = dma.done.wait [#allocation7], 2048  }
  0x26   :  { %1176 = vsyncadd [#allocation7], 4294965248  ;;  %v1005_v0 = vld [vmem:[#allocation4 + $0x4] ss:$8 sps:$4 sm:$0xff]   ;;  %v1007_v1 = vld [vmem:[#allocation4] ss:$8 sps:$4 sm:$0xff]  }
  0x27   :  { %377 = vmatprep.subr.bf16.mxu0 %v1005_v0  ;;  %v1008_v2 = vld [vmem:[#allocation4 + $0x14] ss:$8 sps:$4 sm:$0xff]   ;;  %v1010_v3 = vld [vmem:[#allocation4 + $0x10] ss:$8 sps:$4 sm:$0xff]   ;;  %v1011_v4 = vld [vmem:[#allocation4 + $0x24] ss:$8 sps:$4 sm:$0xff]  }
  0x28   :  { %378 = vmatpush1.bf16.msra.mxu0 %v1007_v1  ;;  %v1013_v5 = vld [vmem:[#allocation4 + $0x20] ss:$8 sps:$4 sm:$0xff]   ;;  %v1014_v6 = vld [vmem:[#allocation4 + $0x34] ss:$8 sps:$4 sm:$0xff]   ;;  %v1016_v7 = vld [vmem:[#allocation4 + $0x30] ss:$8 sps:$4 sm:$0xff]  }
  0x29   :  { %379 = vmatprep.subr.bf16.mxu0 %v1008_v2  ;;  %v1017_v8 = vld [vmem:[#allocation4 + $0x44] ss:$8 sps:$4 sm:$0xff]   ;;  %v1019_v9 = vld [vmem:[#allocation4 + $0x40] ss:$8 sps:$4 sm:$0xff]   ;;  %v1020_v10 = vld [vmem:[#allocation4 + $0x54] ss:$8 sps:$4 sm:$0xff]  }
  0x2a   :  { %v1022_v11 = vld [vmem:[#allocation4 + $0x50] ss:$8 sps:$4 sm:$0xff]   ;;  %v1023_v12 = vld [vmem:[#allocation4 + $0x64] ss:$8 sps:$4 sm:$0xff]   ;;  %v1025_v14 = vld [vmem:[#allocation4 + $0x60] ss:$8 sps:$4 sm:$0xff]  }
  0x2b   :  { %v1055_v13 = vld [vmem:[%s1330_s0 + $0x4] ss:$12 sps:$4 sm:$0xff]   ;;  %v1026_v15 = vld [vmem:[#allocation4 + $0x74] ss:$8 sps:$4 sm:$0xff]   ;;  %v1031_v18 = vld [vmem:[#allocation4 + $0x80] ss:$8 sps:$4 sm:$0xff]  }
  0x2c   :  { %380 = vmatpush1.bf16.msra.mxu0 %v1010_v3  ;;  %409 = vmatprep.mubr.bf16.mxu0 %v1055_v13  ;;  %v1028_v16 = vld [vmem:[#allocation4 + $0x70] ss:$8 sps:$4 sm:$0xff]   ;;  %v1029_v17 = vld [vmem:[#allocation4 + $0x84] ss:$8 sps:$4 sm:$0xff]   ;;  %v1032_v19 = vld [vmem:[#allocation4 + $0x94] ss:$8 sps:$4 sm:$0xff]  }
  0x2d   :  { %381 = vmatprep.subr.bf16.mxu0 %v1011_v4  ;;  %v1034_v20 = vld [vmem:[#allocation4 + $0x90] ss:$8 sps:$4 sm:$0xff]   ;;  %v1035_v21 = vld [vmem:[#allocation4 + $0xa4] ss:$8 sps:$4 sm:$0xff]   ;;  %v1037_v22 = vld [vmem:[#allocation4 + $0xa0] ss:$8 sps:$4 sm:$0xff]   ;;  %v465_v4 = vlaneseq }
  0x2e   :  { %v1038_v23 = vld [vmem:[#allocation4 + $0xb4] ss:$8 sps:$4 sm:$0xff]   ;;  %v1040_v24 = vld [vmem:[#allocation4 + $0xb0] ss:$8 sps:$4 sm:$0xff]   ;;  %v1041_v25 = vld [vmem:[#allocation4 + $0xc4] ss:$8 sps:$4 sm:$0xff]  }
  0x2f   :  { %v1043_v26 = vld [vmem:[#allocation4 + $0xc0] ss:$8 sps:$4 sm:$0xff]   ;;  %v1044_v27 = vld [vmem:[#allocation4 + $0xd4] ss:$8 sps:$4 sm:$0xff]   ;;  %v1046_v28 = vld [vmem:[#allocation4 + $0xd0] ss:$8 sps:$4 sm:$0xff]  }
  0x30   :  { %382 = vmatpush1.bf16.msra.mxu0 %v1013_v5  ;;  %v1047_v29 = vld [vmem:[#allocation4 + $0xe4] ss:$8 sps:$4 sm:$0xff]   ;;  %v1049_v30 = vld [vmem:[#allocation4 + $0xe0] ss:$8 sps:$4 sm:$0xff]   ;;  %v1050_v31 = vld [vmem:[#allocation4 + $0xf4] ss:$8 sps:$4 sm:$0xff]  }
  0x31   :  { %383 = vmatprep.subr.bf16.mxu0 %v1014_v6  ;;  %v1052_v32 = vld [vmem:[#allocation4 + $0xf0] ss:$8 sps:$4 sm:$0xff]   ;;  %v1058_v33 = vld [vmem:[#allocation4 + $0x104] ss:$8 sps:$4 sm:$0xff]   ;;  %v1056_v35 = vld [vmem:[#allocation4 + $0x100] ss:$8 sps:$4 sm:$0xff]  }
  0x32   :  { %v1053_v34 = vld [vmem:[%s1330_s0] ss:$12 sps:$4 sm:$0xff]   ;;  %v1061_v36 = vld [vmem:[#allocation4 + $0x114] ss:$8 sps:$4 sm:$0xff]   ;;  %v1059_v37 = vld [vmem:[#allocation4 + $0x110] ss:$8 sps:$4 sm:$0xff]  }
  0x33   :  { %v1183_v38 = vmov 0   ;;  %v1064_v39 = vld [vmem:[#allocation4 + $0x124] ss:$8 sps:$4 sm:$0xff]   ;;  %v1062_v40 = vld [vmem:[#allocation4 + $0x120] ss:$8 sps:$4 sm:$0xff]   ;;  %v1085_v56 = vld [vmem:[#allocation6 + $0x50] sm:$0xff]  }
  0x34   :  { %384 = vmatpush1.bf16.msra.mxu0 %v1016_v7  ;;  %v1067_v41 = vld [vmem:[#allocation4 + $0x134] ss:$8 sps:$4 sm:$0xff]   ;;  %v1065_v42 = vld [vmem:[#allocation4 + $0x130] ss:$8 sps:$4 sm:$0xff]   ;;  %v1070_v43 = vld [vmem:[#allocation4 + $0x144] ss:$8 sps:$4 sm:$0xff]  }
  0x35   :  { %385 = vmatprep.subr.bf16.mxu0 %v1017_v8  ;;  %v1068_v44 = vld [vmem:[#allocation4 + $0x140] ss:$8 sps:$4 sm:$0xff]   ;;  %v1073_v45 = vld [vmem:[#allocation4 + $0x154] ss:$8 sps:$4 sm:$0xff]   ;;  %v1071_v46 = vld [vmem:[#allocation4 + $0x150] ss:$8 sps:$4 sm:$0xff]  }
  0x36   :  { %v1076_v47 = vld [vmem:[#allocation4 + $0x164] ss:$8 sps:$4 sm:$0xff]   ;;  %v1074_v48 = vld [vmem:[#allocation4 + $0x160] ss:$8 sps:$4 sm:$0xff]   ;;  %v1079_v49 = vld [vmem:[#allocation4 + $0x174] ss:$8 sps:$4 sm:$0xff]  }
  0x37   :  { %v1077_v50 = vld [vmem:[#allocation4 + $0x170] ss:$8 sps:$4 sm:$0xff]   ;;  %v1080_v51 = vld [vmem:[%s1330_s0 + $0x8] ss:$12 sps:$4 sm:$0xff]   ;;  %v1081_v52 = vld [vmem:[#allocation6 + $0x40] sm:$0xff]   ;;  %v466_v5 = vshrl.u32 %v465_v4, 7 }
  0x38   :  { %386 = vmatpush1.bf16.msra.mxu0 %v1019_v9  ;;  %v1082_v53 = vld [vmem:[#allocation6] sm:$0xff]   ;;  %941 = vmatprep.subr.bf16.mxu1 %v1081_v52  ;;  %v1083_v54 = vld [vmem:[#allocation6 + $0x48] sm:$0xff]   ;;  %v1086_v57 = vld [vmem:[#allocation6 + $0x10] sm:$0xff]   ;;  %vm1185_vm0 = vmmov 0  }
  0x39   :  { %387 = vmatprep.subr.bf16.mxu0 %v1020_v10  ;;  %942 = vmatpush3.bf16.msra.mxu1 %v1082_v53  ;;  %v1084_v55 = vld [vmem:[#allocation6 + $0x8] sm:$0xff]   ;;  %v1087_v58 = vld [vmem:[#allocation6 + $0x58] sm:$0xff]   ;;  %v1089_v60 = vld [vmem:[#allocation6 + $0x60] sm:$0xff]   ;;  %v467_v6 = vsub.s32 0, %v466_v5  ;;  %v471_v8 = vsub.s32 1, %v466_v5 }
  0x3a   :  { %943 = vmatprep.subr.bf16.mxu1 %v1083_v54  ;;  %v1088_v59 = vld [vmem:[#allocation6 + $0x18] sm:$0xff]   ;;  %v1090_v61 = vld [vmem:[#allocation6 + $0x20] sm:$0xff]   ;;  %v1091_v62 = vld [vmem:[#allocation6 + $0x68] sm:$0xff]   ;;  %v1184_v54 = vmov 0.0  }
  0x3b   :  { %v1092_v63 = vld [vmem:[#allocation6 + $0x28] sm:$0xff]   ;;  %v1093_v0 = vld [vmem:[#allocation6 + $0x70] sm:$0xff]   ;;  %v1095_v2 = vld [vmem:[#allocation6 + $0x78] sm:$0xff]  }
  0x3c   :  { %388 = vmatpush1.bf16.msra.mxu0 %v1022_v11  ;;  %v1094_v1 = vld [vmem:[#allocation6 + $0x30] sm:$0xff]   ;;  %v1096_v3 = vld [vmem:[#allocation6 + $0x38] sm:$0xff]   ;;  %v463_v7 = vld [vmem:[%s1332_s2] sm:$0x3] }
  0x3d   :  { %389 = vmatprep.subr.bf16.mxu0 %v1023_v12  ;;  %944 = vmatpush3.bf16.msra.mxu1 %v1084_v55  ;;  %v479_v9 = vld [vmem:[%s1333_s3] sm:$0x3]  ;;  %v468_v10 = vrot.slane %v463_v7, %v467_v6  ;;  %v472_v11 = vrot.slane %v463_v7, %v471_v8  ;;  %v1098_v55 = vld [vmem:[%s1337_s7 + $0x8] sm:$0xff]   ;;  %v719_v7 = vstv %s1340_s10 }
  0x3e   :  { %945 = vmatprep.subr.bf16.mxu1 %v1085_v56  ;;  %v484_v12 = vrot.slane %v479_v9, %v467_v6  ;;  %v1097_v53 = vld [vmem:[%s1337_s7] sm:$0xff]   ;;  %v1099_v56 = vld [vmem:[%s1337_s7 + $0x10] sm:$0xff]  }
  0x40   :  { %390 = vmatpush1.bf16.msra.mxu0 %v1025_v14  ;;  %v488_v14 = vrot.slane %v479_v9, %v471_v8 }
  0x41   :  { %391 = vmatprep.subr.bf16.mxu0 %v1026_v15  ;;  %946 = vmatpush3.bf16.msra.mxu1 %v1086_v57  ;;  %v1100_v57 = vld [vmem:[%s1337_s7 + $0x18] sm:$0xff]  }
  0x42   :  { %947 = vmatprep.subr.bf16.mxu1 %v1087_v58  ;;  %v1101_v58 = vld [vmem:[%s1337_s7 + $0x20] sm:$0xff]  }
  0x44   :  { %392 = vmatpush1.bf16.msra.mxu0 %v1028_v16 }
  0x45   :  { %393 = vmatprep.subr.bf16.mxu0 %v1029_v17  ;;  %948 = vmatpush3.bf16.msra.mxu1 %v1088_v59  ;;  %v496_v17 = vstv %s1339_s9  ;;  %v1102_v59 = vld [vmem:[%s1337_s7 + $0x28] sm:$0xff]  }
  0x46   :  { %949 = vmatprep.subr.bf16.mxu1 %v1089_v60  ;;  %v1103_v60 = vld [vmem:[%s1337_s7 + $0x30] sm:$0xff]  }
  0x48   :  { %394 = vmatpush1.bf16.msra.mxu0 %v1031_v18 }
  0x49   :  { %395 = vmatprep.subr.bf16.mxu0 %v1032_v19  ;;  %950 = vmatpush3.bf16.msra.mxu1 %v1090_v61  ;;  %v1104_v61 = vld [vmem:[%s1337_s7 + $0x38] sm:$0xff]  }
  0x4a   :  { %951 = vmatprep.subr.bf16.mxu1 %v1091_v62 }
  0x4c   :  { %396 = vmatpush1.bf16.msra.mxu0 %v1034_v20 }
  0x4d   :  { %397 = vmatprep.subr.bf16.mxu0 %v1035_v21  ;;  %952 = vmatpush3.bf16.msra.mxu1 %v1092_v63 }
  0x4e   :  { %953 = vmatprep.subr.bf16.mxu1 %v1093_v0  ;;  %v928_v0 = vld [vmem:[%s1335_s5] ss:$0 sm:$0xff] }
  0x50   :  { %398 = vmatpush1.bf16.msra.mxu0 %v1037_v22 }
  0x51   :  { %399 = vmatprep.subr.bf16.mxu0 %v1038_v23  ;;  %954 = vmatpush3.bf16.msra.mxu1 %v1094_v1 }
  0x52   :  { %955 = vmatprep.subr.bf16.mxu1 %v1095_v2 }
  0x54   :  { %400 = vmatpush1.bf16.msra.mxu0 %v1040_v24 }
  0x55   :  { %401 = vmatprep.subr.bf16.mxu0 %v1041_v25  ;;  %956 = vmatpush3.bf16.msra.mxu1 %v1096_v3  ;;  %v929_v3 = vld [vmem:[%s1336_s6] ss:$0 sm:$0xff] }
  0x56   :  { %972 = vmatprep.subr.bf16.mxu1 %v1184_v54 }
  0x58   :  { %402 = vmatpush1.bf16.msra.mxu0 %v1043_v26 }
  0x59   :  { %403 = vmatprep.subr.bf16.mxu0 %v1044_v27 }
  0x5c   :  { %404 = vmatpush1.bf16.msra.mxu0 %v1046_v28 }
  0x5d   :  { %405 = vmatprep.subr.bf16.mxu0 %v1047_v29 }
  0x60   :  { %406 = vmatpush1.bf16.msra.mxu0 %v1049_v30 }
  0x61   :  { %407 = vmatprep.subr.bf16.mxu0 %v1050_v31 }
  0x64   :  { %408 = vmatpush1.bf16.msra.mxu0 %v1052_v32 }
  0x65   :  { %420 = vmatprep.subr.bf16.mxu0 %v1058_v33 }
  0x67   :  { %410 = vmatmul.mubr.bf16.vlgmr.msra.gmra.mrb[0].mxu0 %v1053_v34 }
  0x68   :  { %421 = vmatpush1.bf16.msra.mxu0 %v1056_v35  ;;  %452 = vmatprep.mubr.bf16.mxu0 %v1183_v38 }
  0x69   :  { %422 = vmatprep.subr.bf16.mxu0 %v1061_v36 }
  0x6c   :  { %423 = vmatpush1.bf16.msra.mxu0 %v1059_v37 }
  0x6d   :  { %424 = vmatprep.subr.bf16.mxu0 %v1064_v39 }
  0x70   :  { %425 = vmatpush1.bf16.msra.mxu0 %v1062_v40 }
  0x71   :  { %426 = vmatprep.subr.bf16.mxu0 %v1067_v41 }
  0x74   :  { %427 = vmatpush1.bf16.msra.mxu0 %v1065_v42 }
  0x75   :  { %428 = vmatprep.subr.bf16.mxu0 %v1070_v43 }
  0x78   :  { %429 = vmatpush1.bf16.msra.mxu0 %v1068_v44 }
  0x79   :  { %430 = vmatprep.subr.bf16.mxu0 %v1073_v45 }
  0x7c   :  { %431 = vmatpush1.bf16.msra.mxu0 %v1071_v46 }
  0x7d   :  { %432 = vmatprep.subr.bf16.mxu0 %v1076_v47 }
  0x80   :  { %433 = vmatpush1.bf16.msra.mxu0 %v1074_v48 }
  0x81   :  { %434 = vmatprep.subr.bf16.mxu0 %v1079_v49 }
  0x84   :  { %435 = vmatpush1.bf16.msra.mxu0 %v1077_v50 }
  0x87   :  { %453 = vmatmul.mubr.bf16.vlgmr.msra.gmra.mrb[0].mxu0 %v1080_v51 }
 0x15a   :  { %v454_v13 = vpop.f32.mrb[0].mxu0 }
 0x15b   :  { %v475_v15 = vmul.f32 %v468_v10, %v454_v13  ;;  %v456_v16 = vpop.f32.mrb[1].mxu0 }
 0x15c   :  { %v476_v18 = vmul.f32 %v472_v11, %v456_v16  ;;  %v458_v19 = vpop.f32.mrb[2].mxu0 }
 0x15d   :  { %v491_v20 = vadd.f32 %v484_v12, %v475_v15  ;;  %v477_v21 = vmul.f32 %v468_v10, %v458_v19  ;;  %v460_v22 = vpop.f32.mrb[3].mxu0 }
 0x15e   :  { %v492_v23 = vadd.f32 %v488_v14, %v476_v18  ;;  %v478_v24 = vmul.f32 %v472_v11, %v460_v22 }
 0x15f   :  { %v497_v25 = vmul.f32 %v496_v17, %v491_v20  ;;  %v493_v26 = vadd.f32 %v484_v12, %v477_v21 }
 0x160   :  { %v498_v27 = vmul.f32 %v496_v17, %v492_v23  ;;  %v494_v28 = vadd.f32 %v488_v14, %v478_v24  ;;  %v932_v24 = vld [vmem:[%s1338_s8] ss:$0 sm:$0xff] }
 0x161   :  { %v908_v29 = vmul.f32 -1.442695, %v497_v25  ;;  %v499_v30 = vmul.f32 %v496_v17, %v493_v26 }
 0x162   :  { %v909_v31 = vmul.f32 -1.442695, %v498_v27  ;;  %v500_v32 = vmul.f32 %v496_v17, %v494_v28 }
 0x163   :  { %1105 = vpow2.f32 %v908_v29  ;;  %v910_v33 = vmul.f32 -1.442695, %v499_v30 }
 0x164   :  { %1107 = vpow2.f32 %v909_v31  ;;  %v911_v34 = vmul.f32 -1.442695, %v500_v32 }
 0x165   :  { %1109 = vpow2.f32 %v910_v33 }
 0x166   :  { %1111 = vpow2.f32 %v911_v34 }
 0x16d   :  { %v1106_v35 = vpop.eup %1105 }
 0x16e   :  { %v1108_v36 = vpop.eup %1107  ;;  %v513_v37 = vadd.f32 1.0, %v1106_v35 }
 0x16f   :  { %v1110_v38 = vpop.eup %1109  ;;  %v514_v39 = vadd.f32 1.0, %v1108_v36 }
 0x170   :  { %v1112_v40 = vpop.eup %1111  ;;  %1113 = vrcp.f32 %v513_v37  ;;  %v515_v41 = vadd.f32 1.0, %v1110_v38 }
 0x171   :  { %1115 = vrcp.f32 %v514_v39  ;;  %v516_v42 = vadd.f32 1.0, %v1112_v40 }
 0x172   :  { %1117 = vrcp.f32 %v515_v41 }
 0x173   :  { %1119 = vrcp.f32 %v516_v42 }
 0x17a   :  { %v1114_v43 = vpop.eup %1113 }
 0x17b   :  { %v1116_v44 = vpop.eup %1115  ;;  %v525_v47 = vmul.f32 %v1114_v43, %v491_v20 }
 0x17c   :  { %v1118_v45 = vpop.eup %1117  ;;  %v526_v49 = vmul.f32 %v1116_v44, %v492_v23 }
 0x17d   :  { %v1120_v46 = vpop.eup %1119  ;;  %v527_v48 = vmul.f32 %v1118_v45, %v493_v26 }
 0x17e   :  { %v528_v50 = vmul.f32 %v1120_v46, %v494_v28 }
 0x17f   :  { %v529_v51 = vpack.c.bf16 %v527_v48, %v525_v47 }
 0x180   :  { %v530_v52 = vpack.c.bf16 %v528_v50, %v526_v49 }
 0x182   :  { %691 = vmatprep.mubr.bf16.mxu1 %v530_v52 }
 0x183   :  { %692 = vmatmul.mubr.bf16.vlgmr.msra.gmra.mrb[0].mxu1 %v529_v51 }
 0x184   :  { %973 = vmatpush3.bf16.msra.mxu1 %v1097_v53  ;;  %988 = vmatprep.mubr.msk.bf16.mxu1 %vm1185_vm0, %v1184_v54 }
 0x185   :  { %974 = vmatprep.subr.bf16.mxu1 %v1184_v54 }
 0x188   :  { %975 = vmatpush3.bf16.msra.mxu1 %v1098_v55 }
 0x189   :  { %976 = vmatprep.subr.bf16.mxu1 %v1184_v54 }
 0x18c   :  { %977 = vmatpush3.bf16.msra.mxu1 %v1099_v56 }
 0x18d   :  { %978 = vmatprep.subr.bf16.mxu1 %v1184_v54 }
 0x190   :  { %979 = vmatpush3.bf16.msra.mxu1 %v1100_v57 }
 0x191   :  { %980 = vmatprep.subr.bf16.mxu1 %v1184_v54 }
 0x194   :  { %981 = vmatpush3.bf16.msra.mxu1 %v1101_v58 }
 0x195   :  { %982 = vmatprep.subr.bf16.mxu1 %v1184_v54 }
 0x198   :  { %983 = vmatpush3.bf16.msra.mxu1 %v1102_v59 }
 0x199   :  { %984 = vmatprep.subr.bf16.mxu1 %v1184_v54 }
 0x19c   :  { %985 = vmatpush3.bf16.msra.mxu1 %v1103_v60 }
 0x19d   :  { %986 = vmatprep.subr.bf16.mxu1 %v1184_v54 }
 0x1a0   :  { %987 = vmatpush3.bf16.msra.mxu1 %v1104_v61 }
 0x256   :  { %v957_v62 = vpop.f32.mrb[0].mxu1 }
 0x257   :  { %v958_v63 = vpop.f32.mrb[1].mxu1 }
 0x258   :  { %v959_v1 = vadd.f32 %v958_v63, %v957_v62  ;;  %v960_v2 = vpop.f32.mrb[2].mxu1 }
 0x259   :  { %v961_v4 = vpop.f32.mrb[3].mxu1 }
 0x25a   :  { %v707_v5 = vmul.f32 %v959_v1, %v928_v0  ;;  %v962_v6 = vadd.f32 %v961_v4, %v960_v2 }
 0x25c   :  { %v716_v8 = vadd.f32 %v929_v3, %v707_v5  ;;  %v708_v9 = vmul.f32 %v962_v6, %v928_v0 }
 0x25e   :  { %v720_v10 = vmul.f32 %v719_v7, %v716_v8  ;;  %v717_v11 = vadd.f32 %v929_v3, %v708_v9 }
 0x260   :  { %v930_v12 = vmul.f32 -1.442695, %v720_v10  ;;  %v721_v13 = vmul.f32 %v719_v7, %v717_v11 }
 0x262   :  { %1121 = vpow2.f32 %v930_v12  ;;  %v931_v14 = vmul.f32 -1.442695, %v721_v13 }
 0x264   :  { %1123 = vpow2.f32 %v931_v14 }
 0x26c   :  { %v1122_v15 = vpop.eup %1121 }
 0x26d   :  { %v728_v16 = vadd.f32 1.0, %v1122_v15 }
 0x26e   :  { %v1124_v17 = vpop.eup %1123 }
 0x26f   :  { %1125 = vrcp.f32 %v728_v16  ;;  %v729_v18 = vadd.f32 1.0, %v1124_v17 }
 0x271   :  { %1127 = vrcp.f32 %v729_v18 }
 0x279   :  { %v1126_v19 = vpop.eup %1125 }
 0x27a   :  { %v734_v21 = vmul.f32 %v1126_v19, %v716_v8 }
 0x27b   :  { %v1128_v20 = vpop.eup %1127 }
 0x27c   :  { %v735_v22 = vmul.f32 %v1128_v20, %v717_v11 }
 0x27e   :  { %v736_v23 = vpack.c.bf16 %v735_v22, %v734_v21 }
 0x280   :  { %989 = vmatmul.mubr.bf16.vlgmr.msra.gmra.mrb[4].mxu1 %v736_v23 }
 0x353   :  { %v842_v25 = vpop.f32.mrb[4].mxu1 }
 0x354   :  { %v843_v26 = vadd.f32 %v932_v24, %v842_v25  ;;  %v990_v27 = vpop.f32.mrb[5].mxu1 }
 0x355   :  { %v845_v28 = vpop.f32.mrb[6].mxu1 }
 0x356   :  { %849 = vst [vmem:[%s1341_s11] sm:$0xff] %v843_v26  ;;  %v846_v29 = vadd.f32 %v932_v24, %v845_v28  ;;  %v991_v30 = vpop.f32.mrb[7].mxu1 }
 0x358   :  { %850 = vst [vmem:[%s1341_s11 + $0x8] sm:$0xff] %v846_v29 }
 0x359   :  { %855 = vsyncpa [#allocation5], 1 }
 0x35a   :  { %856 = vsyncpa [#allocation7], 1 }

</bundles_post_ra>
